<compile_context>
chip_gen: v5e
topology: v5e:2x2
jax: 0.10.0
libtpu: 0.0.40
codegen_flags: <defaults>
</compile_context>

<pallas_src>
import functools
import math

import jax
import jax.numpy as jnp
from jax.experimental import pallas as pl
from jax.experimental.pallas import tpu as pltpu

_LANES = 128
_ACC_ROWS = 32          # wide accumulator: 32*128 independent f32 add chains


def _cdiv(a, b):
    return -(-a // b)


def _round_up(a, b):
    return _cdiv(a, b) * b


def _tpu_defaults():
    """Generation-dependent block size / VMEM limit / partial count."""
    kind = ""
    try:
        dev = jax.devices()[0]
        if getattr(dev, "platform", "") == "tpu":
            kind = dev.device_kind.lower()
    except Exception:
        pass
    if "v7" in kind:
        # 2 TCs/chip, 64 MiB VMEM, ~3.2 TB/s: 4 MiB blocks + explicit limit.
        return {"block_rows": 8192, "vmem_limit": 40 << 20, "num_partials": 2}
    if "v6" in kind:
        # 1 TC, 128 MiB VMEM: 8 MiB blocks amortize the per-grid-step cost.
        return {"block_rows": 16384, "vmem_limit": 72 << 20, "num_partials": 1}
    if "v5p" in kind or "v4" in kind:
        # Megacore (2 TCs), large VMEM: keep the partial axis.
        return {"block_rows": 8192, "vmem_limit": 48 << 20, "num_partials": 2}
    # v5e / unknown: stay under the 16 MiB scoped-VMEM default.
    return {"block_rows": 4096, "vmem_limit": None, "num_partials": 1}


def _pow_half_alpha(base, alpha):
    """base ** (alpha / 2), specialized at trace time (avoid exp/log on EUP)."""
    half = float(alpha) / 2.0
    if half == 0.5:                       # alpha == 1 (default)
        return jnp.sqrt(base)
    if half == -0.5:                      # alpha == -1
        return jax.lax.rsqrt(base)
    if half == -1.0:                      # alpha == -2
        return pl.reciprocal(base, approx=False)
    if (half * 2.0).is_integer() and 0.0 < abs(half) <= 8.0:
        a = abs(half)
        n = int(a)                        # integer part
        frac = a - n                      # 0.0 or 0.5
        r = None
        if n:
            r = base
            for _ in range(n - 1):
                r = r * base
        if frac:
            s = jnp.sqrt(base)
            r = s if r is None else r * s
        return pl.reciprocal(r, approx=False) if half < 0 else r
    # TODO(synk): last-resort exp/log path is 2 EUP transcendentals/elem and
    # can cap the HBM roofline on v7x for exotic alphas.
    return jnp.power(base, half)


def _robust_loss_kernel(yt_ref, yp_ref, out_ref, *, alpha, coeff, rows, bm,
                        cols, blocks_per_p, group, out_rows):
    pi = pl.program_id(0)
    j = pl.program_id(1)

    # Output block index is constant across j -> resident accumulator.
    @pl.when(j == 0)
    def _init():
        out_ref[...] = jnp.zeros_like(out_ref)

    def elem_loss(row_mask=None):
        x = yt_ref[...].astype(jnp.float32) - yp_ref[...].astype(jnp.float32)
        base = (x * x) * coeff + 1.0                 # coeff = 1/(c^2*|a-2|)
        loss = _pow_half_alpha(base, alpha) - 1.0    # keep -1 so masked/zero
        if row_mask is not None:                     # elements contribute 0
            loss = jnp.where(row_mask, loss, 0.0)
        return loss

    def accumulate(loss):
        if group:
            # Lane-dense path (cols == 128): vreg-aligned partial sums, pure
            # VPU adds into (group,128) independent chains.
            out_ref[...] += loss.reshape(bm // group, group, cols).sum(axis=0)
        else:
            # Ragged-lane / tiny-block path: one full reduce per block.
            s = jnp.sum(loss)
            r = jax.lax.broadcasted_iota(jnp.int32, (out_rows, _LANES), 0)
            c = jax.lax.broadcasted_iota(jnp.int32, (out_rows, _LANES), 1)
            out_ref[...] += jnp.where(jnp.logical_and(r == 0, c == 0), s, 0.0)

    if rows % bm == 0:
        # Statically no ragged block: single clean hot path.
        accumulate(elem_loss())
    else:
        start = (pi * blocks_per_p + j) * bm
        valid = rows - start

        @pl.when(valid >= bm)                        # full block (hot path)
        def _full():
            accumulate(elem_loss())

        @pl.when(jnp.logical_and(valid > 0, valid < bm))   # ragged last block
        def _ragged():
            rid = jax.lax.broadcasted_iota(jnp.int32, (bm, cols), 0)
            accumulate(elem_loss(rid < valid))


def robust_loss(y_true, y_pred, *, alpha=1, c=1, block_rows=None,
                num_partials=None, vmem_limit_bytes=None):
    assert y_true.shape == y_pred.shape
    if alpha == 0 or alpha == 2:
        # Same restriction as the PyTorch reference (division by zero).
        raise ValueError("alpha=0 and alpha=2 are undefined in this formulation")

    defaults = _tpu_defaults()
    block_rows = defaults["block_rows"] if block_rows is None else block_rows
    num_partials = defaults["num_partials"] if num_partials is None else num_partials
    if vmem_limit_bytes is None:
        vmem_limit_bytes = defaults["vmem_limit"]

    n_batch = y_true.shape[0]
    total = math.prod(y_true.shape)
    abs_am2 = abs(alpha - 2)
    scale = float(abs_am2) / float(alpha)            # deferred to epilogue
    coeff = 1.0 / (float(c) * float(c) * float(abs_am2))

    # ---- zero-copy 2-D view (no jnp.pad; ragged blocks masked in-kernel) ---
    if total % _LANES == 0:
        rows, cols = total // _LANES, _LANES          # lane-dense fast path
    else:
        rows, cols = n_batch, total // n_batch        # (N, C*H*W), zero-copy
    yt = y_true.reshape(rows, cols)
    yp = y_pred.reshape(rows, cols)

    # ---- block rows: generation target, bounded by per-buffer VMEM ---------
    cols_pad = _round_up(cols, _LANES)
    target = (max(8, (block_rows * _LANES) // cols_pad) // 8) * 8
    bm = rows if target >= rows else target

    per_buf_bytes = bm * cols_pad * y_true.dtype.itemsize
    if per_buf_bytes > block_rows * _LANES * 8:
        # TODO(synk): tile the trailing (non-128-divisible) axis with column
        # masking instead of this pure-JAX fallback for pathological widths.
        return _robust_loss_ref(y_true, y_pred, alpha=alpha, c=c)

    nblocks = _cdiv(rows, bm)
    p = num_partials if (num_partials > 1 and nblocks >= num_partials
                         and nblocks % num_partials == 0) else 1
    bpp = nblocks // p

    # ---- accumulator layout -------------------------------------------------
    if cols == _LANES and bm % _ACC_ROWS == 0:
        group = _ACC_ROWS
    elif cols == _LANES and bm % 8 == 0:
        group = 8
    else:
        group = 0
    out_rows = group if group else 8

    kernel = functools.partial(
        _robust_loss_kernel, alpha=alpha, coeff=coeff, rows=rows, bm=bm,
        cols=cols, blocks_per_p=bpp, group=group, out_rows=out_rows)

    partials = pl.pallas_call(
        kernel,
        out_shape=jax.ShapeDtypeStruct((p * out_rows, _LANES), jnp.float32),
        grid_spec=pltpu.PrefetchScalarGridSpec(
            num_scalar_prefetch=0,
            grid=(p, bpp),
            in_specs=[
                pl.BlockSpec((bm, cols), lambda pi, j: (pi * bpp + j, 0)),
                pl.BlockSpec((bm, cols), lambda pi, j: (pi * bpp + j, 0)),
            ],
            out_specs=pl.BlockSpec((out_rows, _LANES), lambda pi, j: (pi, 0)),
        ),
        # TODO(synk): on v7x, switch the leading axis to pltpu.CORE_PARALLEL
        # once the 2-TensorCore split has been verified in a trace.
        compiler_params=pltpu.CompilerParams(
            dimension_semantics=("parallel", "arbitrary"),
            vmem_limit_bytes=vmem_limit_bytes,
        ),
    )(yt, yp)

    # Tiny final reduce + deferred scale + batch mean in plain JAX.
    return jnp.sum(partials) * jnp.float32(scale) / jnp.float32(n_batch)


def _robust_loss_ref(y_true, y_pred, alpha=1, c=1):
    x = y_true.astype(jnp.float32) - y_pred.astype(jnp.float32)
    abs_alpha = abs(alpha - 2)
    exponent_part = (jnp.abs(x) / c) ** 2
    loss = (abs_alpha / alpha) * (
        jnp.power(exponent_part / abs_alpha + 1.0, alpha / 2.0) - 1.0)
    loss = loss.reshape(loss.shape[0], -1).sum(axis=1)
    return jnp.mean(loss, axis=0)


if __name__ == "__main__":
    key = jax.random.PRNGKey(0)
    k1, k2, k3, k4, k5, k6, k7, k8 = jax.random.split(key, 8)

    # 1) NCHW shape implied by the module: batch=2, channels=4, spatial 16x16.
    yt = jax.random.normal(k1, (2, 4, 16, 16), dtype=jnp.float32)
    yp = jax.random.normal(k2, (2, 4, 16, 16), dtype=jnp.float32)
    out = jax.block_until_ready(robust_loss(yt, yp, alpha=1, c=1))
    ref = _robust_loss_ref(yt, yp, alpha=1, c=1)
    assert jnp.allclose(out, ref, rtol=1e-5, atol=1e-5), (out, ref)

    # 2) total % 128 != 0 -> zero-copy (N, C*H*W) path (no padding copy).
    yt2 = jax.random.normal(k3, (2, 3, 20, 20), dtype=jnp.float32)
    yp2 = jax.random.normal(k4, (2, 3, 20, 20), dtype=jnp.float32)
    out2 = jax.block_until_ready(robust_loss(yt2, yp2, alpha=1, c=2))
    ref2 = _robust_loss_ref(yt2, yp2, alpha=1, c=2)
    assert jnp.allclose(out2, ref2, rtol=1e-5, atol=1e-5), (out2, ref2)

    # 3) Ragged last row-block + 2 partials + reciprocal power (alpha=-2).
    yt3 = jax.random.normal(k5, (2, 5, 24, 16), dtype=jnp.float32)
    yp3 = jax.random.normal(k6, (2, 5, 24, 16), dtype=jnp.float32)
    out3 = jax.block_until_ready(
        robust_loss(yt3, yp3, alpha=-2, c=1.5, block_rows=8, num_partials=2))
    ref3 = _robust_loss_ref(yt3, yp3, alpha=-2, c=1.5)
    assert jnp.allclose(out3, ref3, rtol=1e-5, atol=1e-5), (out3, ref3)

    # 4) Larger lane-dense path: wide (32,128) accumulator, multi-block,
    #    2 partials, bf16 inputs kept bf16 through the BlockSpec.
    yt4 = jax.random.normal(k7, (8, 8, 64, 128), dtype=jnp.bfloat16)
    yp4 = jax.random.normal(k8, (8, 8, 64, 128), dtype=jnp.bfloat16)
    out4 = jax.block_until_ready(
        robust_loss(yt4, yp4, alpha=1, c=1, block_rows=512, num_partials=2))
    ref4 = _robust_loss_ref(yt4, yp4, alpha=1, c=1)
    assert jnp.allclose(out4, ref4, rtol=1e-3, atol=1e-3), (out4, ref4)

    print("KERNEL_OK")
</pallas_src>

<mosaic_0001>
module attributes {stable_mosaic.version = 11 : i64} {
  func.func @_robust_loss_kernel(%arg0: i32, %arg1: i32, %arg2: memref<16x128xf32, #tpu.memory_space<vmem>>, %arg3: memref<16x128xf32, #tpu.memory_space<vmem>>, %arg4: memref<8x128xf32, #tpu.memory_space<vmem>>) attributes {dimension_semantics = [#tpu.dimension_semantics<parallel>, #tpu.dimension_semantics<arbitrary>], iteration_bounds = array<i64: 1, 1>, scalar_prefetch = 0 : i64, scratch_operands = 0 : i64, tpu.core_type = #tpu.core_type<tc>, window_params = [{transform_indices = @transform_0, window_bounds = array<i64: 16, 128>}, {transform_indices = @transform_1, window_bounds = array<i64: 16, 128>}, {transform_indices = @transform_2, window_bounds = array<i64: 8, 128>}]} {
    %c0_i32 = arith.constant 0 : i32
    %0 = arith.cmpi eq, %arg1, %c0_i32 : i32
    %1 = arith.extui %0 : i1 to i32
    %c0_i32_0 = arith.constant 0 : i32
    %2 = arith.cmpi ne, %1, %c0_i32_0 : i32
    scf.if %2 {
      %cst_11 = arith.constant 0.000000e+00 : f32
      %19 = vector.broadcast %cst_11 : f32 to vector<8x128xf32>
      %c0_12 = arith.constant 0 : index
      %c0_13 = arith.constant 0 : index
      %20 = vector.load %arg4[%c0_12, %c0_13] : memref<8x128xf32, #tpu.memory_space<vmem>>, vector<8x128xf32>
      tpu.vector_store %arg4[%c0_12, %c0_13], %19 {strides = array<i32>} : memref<8x128xf32, #tpu.memory_space<vmem>>, vector<8x128xf32>,
    } else {
    }
    %c0 = arith.constant 0 : index
    %c0_1 = arith.constant 0 : index
    %3 = vector.load %arg2[%c0, %c0_1] : memref<16x128xf32, #tpu.memory_space<vmem>>, vector<16x128xf32>
    %c0_2 = arith.constant 0 : index
    %c0_3 = arith.constant 0 : index
    %4 = vector.load %arg3[%c0_2, %c0_3] : memref<16x128xf32, #tpu.memory_space<vmem>>, vector<16x128xf32>
    %5 = arith.subf %3, %4 : vector<16x128xf32>
    %6 = arith.mulf %5, %5 : vector<16x128xf32>
    %cst = arith.constant 1.000000e+00 : f32
    %7 = vector.broadcast %cst : f32 to vector<16x128xf32>
    %8 = arith.mulf %6, %7 : vector<16x128xf32>
    %cst_4 = arith.constant 1.000000e+00 : f32
    %9 = vector.broadcast %cst_4 : f32 to vector<16x128xf32>
    %10 = arith.addf %8, %9 : vector<16x128xf32>
    %11 = math.sqrt %10 : vector<16x128xf32>
    %cst_5 = arith.constant 1.000000e+00 : f32
    %12 = vector.broadcast %cst_5 : f32 to vector<16x128xf32>
    %13 = arith.subf %11, %12 : vector<16x128xf32>
    %c0_6 = arith.constant 0 : index
    %c0_7 = arith.constant 0 : index
    %14 = vector.load %arg4[%c0_6, %c0_7] : memref<8x128xf32, #tpu.memory_space<vmem>>, vector<8x128xf32>
    %15 = vector.shape_cast %13 : vector<16x128xf32> to vector<2x8x128xf32>
    %cst_8 = arith.constant dense<0.000000e+00> : vector<8x128xf32>
    %16 = vector.multi_reduction <add>, %15, %cst_8 [0] : vector<2x8x128xf32> to vector<8x128xf32>
    %17 = arith.addf %14, %16 : vector<8x128xf32>
    %c0_9 = arith.constant 0 : index
    %c0_10 = arith.constant 0 : index
    %18 = vector.load %arg4[%c0_9, %c0_10] : memref<8x128xf32, #tpu.memory_space<vmem>>, vector<8x128xf32>
    tpu.vector_store %arg4[%c0_9, %c0_10], %17 {strides = array<i32>} : memref<8x128xf32, #tpu.memory_space<vmem>>, vector<8x128xf32>,
    return
  }
  func.func @transform_0(%arg0: i32, %arg1: i32) -> (i32, i32) {
    %c1_i32 = arith.constant 1 : i32
    %0 = arith.muli %arg0, %c1_i32 : i32
    %1 = arith.addi %0, %arg1 : i32
    %c0_i32 = arith.constant 0 : i32
    %c0_i32_0 = arith.constant 0 : i32
    return %1, %c0_i32 : i32, i32
  }
  func.func @transform_1(%arg0: i32, %arg1: i32) -> (i32, i32) {
    %c1_i32 = arith.constant 1 : i32
    %0 = arith.muli %arg0, %c1_i32 : i32
    %1 = arith.addi %0, %arg1 : i32
    %c0_i32 = arith.constant 0 : i32
    %c0_i32_0 = arith.constant 0 : i32
    return %1, %c0_i32 : i32, i32
  }
  func.func @transform_2(%arg0: i32, %arg1: i32) -> (i32, i32) {
    %c0_i32 = arith.constant 0 : i32
    %c0_i32_0 = arith.constant 0 : i32
    return %arg0, %c0_i32 : i32, i32
  }
}

</mosaic_0001>

<bundles_post_ra>
// kernel: tpu_custom_call.1
= control target key start
LH: loop header
LB: loop body
LE: loop exit
PB: predicated region body
PF: predicated region fallthrough
CT: control target
= control target key end

     0   :  { %7 = vsyncpa [#allocation3], 0  ;;  %s238_s0 = inlined_call_operand.hbm [shape: f32[16,128], index: 0, kind: input, shape index: {}]   ;;  %s239_s1 = inlined_call_operand.hbm [shape: f32[16,128], index: 1, kind: input, shape index: {}]   ;;  %s240_s2 = inlined_call_operand.hbm [shape: f32[8,128], index: 2, kind: output, shape index: {}]  }
   0x1   :  { %8 = vsyncpa [#allocation6], 0 }
   0x2   :  { %9 = vsyncpa [#allocation4], 0  ;;  %s18_s11 = sshll.u32 %s238_s0, 4  ;;  %s209_s12 = smov [#allocation2]   ;;  %s19_s11 = int_to_ptr.hbm [resolvable:$true] %s18_s11 }
   0x3   :  { %s20_s13 = sshll.u32 %s209_s12, 4  ;;  %s35_s16 = sshll.u32 %s239_s1, 4  ;;  %s21_s13 = int_to_ptr.vmem [resolvable:$true] %s20_s13  ;;  %s36_s16 = int_to_ptr.hbm [resolvable:$true] %s35_s16 }
   0x4   :  { %s210_s17 = smov 128   ;;  %s211_s18 = smov 8  }
   0x5   :  { %26 = dma.hbm_to_vmem [thread:$0]  %s19_s11, 256, %s21_s13, [#allocation3], %s210_s17, %s210_s17, %s211_s18  }
   0x6   :  { %s212_s19 = smov [#allocation5]  }
   0x7   :  { %s37_s20 = sshll.u32 %s212_s19, 4  ;;  %s38_s20 = int_to_ptr.vmem [resolvable:$true] %s37_s20 }
   0x8   :  { %43 = dma.hbm_to_vmem [thread:$0]  %s36_s16, 256, %s38_s20, [#allocation6], %s210_s17, %s210_s17, %s211_s18  }
   0x9   :  { %203 = dma.done.wait [#allocation3], 256  }
   0xa   :  { %204 = vsyncadd [#allocation3], 4294967040 }
   0xb   :  { %205 = dma.done.wait [#allocation6], 256  }
   0xc   :  { %206 = vsyncadd [#allocation6], 4294967040  ;;  %v61_v0 = vld [vmem:[#allocation2] sm:$0xff]  ;;  %v62_v1 = vld [vmem:[#allocation2 + $0x8] sm:$0xff]  ;;  %s213_s0 = smov [#allocation7]   ;;  %s108_s23 = sshll.u32 %s240_s2, 4  ;;  %s109_s23 = int_to_ptr.hbm [resolvable:$true] %s108_s23 }
   0xd   :  { %v63_v2 = vld [vmem:[#allocation5] sm:$0xff]  ;;  %v64_v3 = vld [vmem:[#allocation5 + $0x8] sm:$0xff]  ;;  %s106_s1 = sshll.u32 %s213_s0, 4  ;;  %s107_s1 = int_to_ptr.vmem [resolvable:$true] %s106_s1 }
   0xe   :  { %v65_v4 = vsub.f32 %v61_v0, %v63_v2  ;;  %v66_v5 = vsub.f32 %v62_v1, %v64_v3 }
  0x10   :  { %v67_v6 = vmul.f32 %v65_v4, %v65_v4  ;;  %v68_v7 = vmul.f32 %v66_v5, %v66_v5 }
  0x12   :  { %v69_v8 = vadd.f32 1.0, %v67_v6  ;;  %v70_v9 = vadd.f32 1.0, %v68_v7 }
  0x14   :  { %127 = vrsqrt.f32 %v69_v8  ;;  %vm78_vm0 = vcmp.eq.f32.partialorder %v69_v8, inf  ;;  %v81_v21 = vand.u32 2147483648, %v69_v8  ;;  %vm80_vm1 = vcmp.eq.f32.partialorder %v69_v8, 0.0 }
  0x15   :  { %129 = vrsqrt.f32 %v70_v9  ;;  %vm90_vm2 = vcmp.eq.f32.partialorder %v70_v9, inf  ;;  %v93_v24 = vand.u32 2147483648, %v70_v9  ;;  %vm92_vm3 = vcmp.eq.f32.partialorder %v70_v9, 0.0 }
  0x1a   :  { %v128_v10 = vpop.eup %127 }
  0x1b   :  { %v130_v11 = vpop.eup %129  ;;  %v72_v12 = vmul.f32 %v128_v10, %v69_v8 }
  0x1c   :  { %v84_v13 = vmul.f32 %v130_v11, %v70_v9 }
  0x1d   :  { %v73_v14 = vmul.f32 %v128_v10, %v72_v12 }
  0x1e   :  { %v85_v15 = vmul.f32 %v130_v11, %v84_v13 }
  0x1f   :  { %v74_v16 = vmul.f32 0.5, %v73_v14 }
  0x20   :  { %v86_v17 = vmul.f32 0.5, %v85_v15 }
  0x21   :  { %v75_v18 = vsub.f32 1.5, %v74_v16 }
  0x22   :  { %v87_v19 = vsub.f32 1.5, %v86_v17 }
  0x23   :  { %v76_v20 = vmul.f32 %v128_v10, %v75_v18 }
  0x24   :  { %v88_v22 = vmul.f32 %v130_v11, %v87_v19 }
  0x25   :  { %v77_v23 = vmul.f32 %v76_v20, %v69_v8 }
  0x26   :  { %v89_v25 = vmul.f32 %v88_v22, %v70_v9 }
  0x27   :  { %v79_v26 = vsel %vm78_vm0, %v69_v8, %v77_v23 }
  0x28   :  { %v82_v27 = vsel %vm80_vm1, %v81_v21, %v79_v26  ;;  %v91_v28 = vsel %vm90_vm2, %v70_v9, %v89_v25 }
  0x29   :  { %v94_v29 = vsel %vm92_vm3, %v93_v24, %v91_v28  ;;  %v119_v30 = vadd.f32 -1.0, %v82_v27 }
  0x2a   :  { %v120_v31 = vadd.f32 -1.0, %v94_v29 }
  0x2c   :  { %v98_v32 = vadd.f32 %v120_v31, %v119_v30 }
  0x2e   :  { %100 = vst [vmem:[#allocation7] sm:$0xff] %v98_v32 }
  0x2f   :  { %111 = dma.vmem_to_hbm [thread:$0]  %s107_s1, 128, %s109_s23, [#allocation4]  }
  0x30   :  { %207 = dma.done.wait [#allocation4], 128  }
  0x31   :  { %208 = vsyncadd [#allocation4], 4294967168 }
  0x32   :  { %116 = vsyncpa [#allocation3], 1 }
  0x33   :  { %117 = vsyncpa [#allocation6], 1 }
  0x34   :  { %118 = vsyncpa [#allocation4], 1 }

</bundles_post_ra>
